<compile_context>
chip_gen: v7x
topology: tpu7x:2x2x1
jax: 0.10.0
libtpu: 0.0.40
codegen_flags: <defaults>
</compile_context>

<pallas_src>
import math
import functools

import jax
import jax.numpy as jnp
from jax import lax
from jax.experimental import pallas as pl
from jax.experimental.pallas import tpu as pltpu

LAMDA = 2.0      # self.lamda in the PyTorch module
EPS = 1e-12      # F.normalize eps (clamp_min on the column norm)


def _round_up(a, b):
    return (a + b - 1) // b * b


def _pui_partials_kernel(x_ref, y_ref,
                         gxy_out, gxx_out, gyy_out, psum_out,
                         gxy_acc, gxx_acc, gyy_acc, p_acc, ones_buf):
    """Grid = (C, S): C reduction splits (parallel axis), S row tiles each."""
    s = pl.program_id(1)

    @pl.when(s == 0)
    def _init():
        gxy_acc[...] = jnp.zeros_like(gxy_acc)
        gxx_acc[...] = jnp.zeros_like(gxx_acc)
        gyy_acc[...] = jnp.zeros_like(gyy_acc)
        p_acc[...] = jnp.zeros_like(p_acc)
        ones_buf[...] = jnp.ones_like(ones_buf)

    x = x_ref[...]                       # (TN, K), input dtype
    y = y_ref[...]

    # All per-tile statistics on the MXU (contract the N / sublane axis).
    dn = (((0,), (0,)), ((), ()))
    gxy_acc[...] += lax.dot_general(x, y, dn, preferred_element_type=jnp.float32)
    gxx_acc[...] += lax.dot_general(x, x, dn, preferred_element_type=jnp.float32)
    gyy_acc[...] += lax.dot_general(y, y, dn, preferred_element_type=jnp.float32)
    # Column sum of x as a matmul: ones(8, TN) @ x -> (8, K), all rows equal.
    p_acc[...] += jnp.dot(ones_buf[...], x, preferred_element_type=jnp.float32)

    @pl.when(s == pl.num_programs(1) - 1)
    def _flush():
        gxy_out[...] = gxy_acc[...]
        gxx_out[...] = gxx_acc[...]
        gyy_out[...] = gyy_acc[...]
        psum_out[...] = p_acc[...]


def _pui_combine_kernel(gxy_ref, gxx_ref, gyy_ref, psum_ref, o_ref):
    """Tiny epilogue: combine per-core partials, normalize, CE + entropy."""
    K = gxy_ref.shape[1]

    gxy = jnp.sum(gxy_ref[...], axis=0)                    # (K, K)
    gxx = jnp.sum(gxx_ref[...], axis=0)                    # (K, K)
    gyy = jnp.sum(gyy_ref[...], axis=0)                    # (K, K)
    p = jnp.sum(psum_ref[...], axis=0)[0:1, :]             # (1, K)

    row = lax.broadcasted_iota(jnp.int32, (K, K), 0)
    col = lax.broadcasted_iota(jnp.int32, (K, K), 1)
    diag_mask = row == col

    # F.normalize clamp semantics: rsqrt(max(ss, eps^2)) == 1 / max(||.||, eps).
    # Diagonals extracted as a column / a row so both scalings are plain
    # sublane / lane broadcasts (no relayout, no extra MXU work).
    xsq_col = jnp.sum(jnp.where(diag_mask, gxx, 0.0), axis=1, keepdims=True)  # (K,1)
    ysq_row = jnp.sum(jnp.where(diag_mask, gyy, 0.0), axis=0, keepdims=True)  # (1,K)
    inv_x = lax.rsqrt(jnp.maximum(xsq_col, jnp.float32(EPS * EPS)))
    inv_y = lax.rsqrt(jnp.maximum(ysq_row, jnp.float32(EPS * EPS)))
    pui = gxy * inv_x * inv_y                              # (K, K)

    # CrossEntropyLoss(pui, arange(K)), reduction='mean':
    #   mean_i [ logsumexp_j(pui[i, j]) - pui[i, i] ]
    m = jnp.max(pui, axis=1, keepdims=True)                                    # (K,1)
    lse = m + jnp.log(jnp.sum(jnp.exp(pui - m), axis=1, keepdims=True))        # (K,1)
    diag = jnp.sum(jnp.where(diag_mask, pui, 0.0), axis=1, keepdims=True)      # (K,1)
    loss_ce = jnp.sum(lse - diag, axis=0, keepdims=True) * jnp.float32(1.0 / K)  # (1,1)

    # p = x.sum(0); p /= p.sum(); loss_ne = log(K) + sum(p * log(p)).
    # NaN-guard the p == 0 case (0 * log 0 -> 0); exact for softmax inputs.
    p = p / jnp.sum(p)
    plogp = jnp.where(p > 0,
                      p * jnp.log(jnp.maximum(p, jnp.float32(1e-30))),
                      jnp.float32(0.0))
    loss_ne = jnp.float32(math.log(K)) + jnp.sum(plogp, axis=1, keepdims=True)   # (1,1)

    o_ref[...] = loss_ce + jnp.float32(LAMDA) * loss_ne


@functools.partial(jax.jit, static_argnames=("tn_max", "num_splits"))
def pui_loss(x, y, *, tn_max=8192, num_splits=2):
    assert x.shape == y.shape, 'Inputs are required to have same shape'
    N, K = x.shape
    itemsize = jnp.dtype(x.dtype).itemsize
    sub = {4: 8, 2: 16, 1: 32}.get(itemsize, 8)        # sublane granule per dtype
    lane = 128
    k_pad = _round_up(K, lane)                         # lanes occupied by one row

    # Split the N reduction across cores only when there is enough work; on
    # single-core chips the extra split is just another sequential pass.
    C = num_splits if (num_splits > 1 and N >= num_splits * max(tn_max, sub)) else 1

    # Row tile: as large as possible (per-grid-step overhead dominates at small
    # K), clamped so 2 inputs x 2 pipeline buffers of the lane-padded tile stay
    # <= 24 MiB (headroom inside v7x's 64 MiB physical VMEM).
    n_bufs = 2
    tn_cap = max(sub, (24 << 20) // (2 * n_bufs * k_pad * itemsize) // sub * sub)
    TN = min(max(tn_max, sub), _round_up(pl.cdiv(N, C), sub), tn_cap)
    TN = _round_up(TN, sub)
    S = pl.cdiv(N, C * TN)
    N_pad = C * S * TN
    if N_pad != N:
        # Zero rows contribute nothing to any Gram / column-sum accumulator.
        x = jnp.pad(x, ((0, N_pad - N), (0, 0)))
        y = jnp.pad(y, ((0, N_pad - N), (0, 0)))

    # Explicit VMEM budget from the lane-padded tiles (K pads to 128 lanes) so
    # large TN also compiles under v5e's ~16 MiB default scoped VMEM limit.
    in_vmem = 2 * n_bufs * TN * k_pad * itemsize
    scratch_vmem = (3 * _round_up(K, 8) * k_pad * 4 + 8 * k_pad * 4
                    + _round_up(8, sub) * _round_up(TN, lane) * itemsize)
    vmem_limit = int(max(in_vmem + scratch_vmem + (4 << 20), 32 << 20))

    cost = pl.CostEstimate(
        flops=N_pad * (6 * K * K + 16 * K),
        transcendentals=0,
        bytes_accessed=2 * N_pad * K * itemsize + C * (3 * K * K + 8 * K) * 4,
    )

    idx_in = lambda c, s, S=S: (c * S + s, 0)
    gxy_p, gxx_p, gyy_p, psum_p = pl.pallas_call(
        _pui_partials_kernel,
        grid=(C, S),
        in_specs=[pl.BlockSpec((TN, K), idx_in),
                  pl.BlockSpec((TN, K), idx_in)],
        out_shape=(jax.ShapeDtypeStruct((C, K, K), jnp.float32),
                   jax.ShapeDtypeStruct((C, K, K), jnp.float32),
                   jax.ShapeDtypeStruct((C, K, K), jnp.float32),
                   jax.ShapeDtypeStruct((C, 8, K), jnp.float32)),
        out_specs=(pl.BlockSpec((None, K, K), lambda c, s: (c, 0, 0)),
                   pl.BlockSpec((None, K, K), lambda c, s: (c, 0, 0)),
                   pl.BlockSpec((None, K, K), lambda c, s: (c, 0, 0)),
                   pl.BlockSpec((None, 8, K), lambda c, s: (c, 0, 0))),
        scratch_shapes=[pltpu.VMEM((K, K), jnp.float32),   # Gxy accumulator
                        pltpu.VMEM((K, K), jnp.float32),   # Gxx accumulator
                        pltpu.VMEM((K, K), jnp.float32),   # Gyy accumulator
                        pltpu.VMEM((8, K), jnp.float32),   # column-sum accumulator
                        pltpu.VMEM((8, TN), x.dtype)],     # ones tile for ones @ x
        compiler_params=pltpu.CompilerParams(
            dimension_semantics=("parallel", "arbitrary"),
            vmem_limit_bytes=vmem_limit),
        cost_estimate=cost,
    )(x, y)

    out = pl.pallas_call(
        _pui_combine_kernel,
        grid=(1,),
        in_specs=[pl.BlockSpec((C, K, K), lambda i: (0, 0, 0)),
                  pl.BlockSpec((C, K, K), lambda i: (0, 0, 0)),
                  pl.BlockSpec((C, K, K), lambda i: (0, 0, 0)),
                  pl.BlockSpec((C, 8, K), lambda i: (0, 0, 0))],
        out_shape=jax.ShapeDtypeStruct((1, 1), jnp.float32),
        out_specs=pl.BlockSpec((1, 1), lambda i: (0, 0)),
        compiler_params=pltpu.CompilerParams(
            dimension_semantics=("arbitrary",)),
    )(gxy_p, gxx_p, gyy_p, psum_p)
    return out[0, 0]


def pui_loss_ref(x, y):
    # Pure-JAX reference matching the PyTorch semantics.
    xhat = x / jnp.maximum(jnp.linalg.norm(x, axis=0, keepdims=True), EPS)
    yhat = y / jnp.maximum(jnp.linalg.norm(y, axis=0, keepdims=True), EPS)
    pui = xhat.T @ yhat
    K = pui.shape[0]
    log_probs = pui - jax.scipy.special.logsumexp(pui, axis=1, keepdims=True)
    loss_ce = -jnp.mean(jnp.diag(log_probs))
    p = x.sum(0)
    p = p / p.sum()
    loss_ne = math.log(K) + jnp.sum(p * jnp.log(p))
    return loss_ce + LAMDA * loss_ne


if __name__ == "__main__":
    key = jax.random.PRNGKey(0)
    kx, ky = jax.random.split(key)

    # Small shapes consistent with the module: N samples x K cluster probs.
    N, K = 16, 10
    x = jax.nn.softmax(jax.random.normal(kx, (N, K), dtype=jnp.float32), axis=-1)
    y = jax.nn.softmax(jax.random.normal(ky, (N, K), dtype=jnp.float32), axis=-1)

    loss = jax.block_until_ready(pui_loss(x, y))
    ref = jax.block_until_ready(pui_loss_ref(x, y))
    assert jnp.isfinite(loss), "kernel produced non-finite loss"
    assert jnp.allclose(loss, ref, rtol=1e-4, atol=1e-4), (loss, ref)

    # Multi-tile / multi-split path: N not a multiple of the tile -> padding,
    # several grid steps per split, and the two-way (C=2) reduction split.
    N2 = 200
    kx2, ky2 = jax.random.split(ky)
    x2 = jax.nn.softmax(jax.random.normal(kx2, (N2, K), dtype=jnp.float32), axis=-1)
    y2 = jax.nn.softmax(jax.random.normal(ky2, (N2, K), dtype=jnp.float32), axis=-1)
    loss2 = jax.block_until_ready(pui_loss(x2, y2, tn_max=64))
    ref2 = jax.block_until_ready(pui_loss_ref(x2, y2))
    assert jnp.isfinite(loss2), "kernel produced non-finite loss (tiled path)"
    assert jnp.allclose(loss2, ref2, rtol=1e-4, atol=1e-4), (loss2, ref2)

    print("KERNEL_OK")
</pallas_src>

<mosaic_0001>
module attributes {stable_mosaic.version = 11 : i64} {
  func.func @_pui_combine_kernel(%arg0: i32, %arg1: memref<1x10x10xf32, #tpu.memory_space<vmem>>, %arg2: memref<1x10x10xf32, #tpu.memory_space<vmem>>, %arg3: memref<1x10x10xf32, #tpu.memory_space<vmem>>, %arg4: memref<1x8x10xf32, #tpu.memory_space<vmem>>, %arg5: memref<1x1xf32, #tpu.memory_space<vmem>>) attributes {dimension_semantics = [#tpu.dimension_semantics<arbitrary>], iteration_bounds = array<i64: 1>, scalar_prefetch = 0 : i64, scratch_operands = 0 : i64, tpu.core_type = #tpu.core_type<tc>, window_params = [{pipeline_mode = #tpu.pipeline_mode<synchronous>, transform_indices = @transform_0, window_bounds = array<i64: 1, 10, 10>}, {pipeline_mode = #tpu.pipeline_mode<synchronous>, transform_indices = @transform_1, window_bounds = array<i64: 1, 10, 10>}, {pipeline_mode = #tpu.pipeline_mode<synchronous>, transform_indices = @transform_2, window_bounds = array<i64: 1, 10, 10>}, {pipeline_mode = #tpu.pipeline_mode<synchronous>, transform_indices = @transform_3, window_bounds = array<i64: 1, 8, 10>}, {pipeline_mode = #tpu.pipeline_mode<synchronous>, transform_indices = @transform_4, window_bounds = array<i64: 1, 1>}]} {
    %c0 = arith.constant 0 : index
    %c0_0 = arith.constant 0 : index
    %c0_1 = arith.constant 0 : index
    %0 = vector.load %arg1[%c0, %c0_0, %c0_1] : memref<1x10x10xf32, #tpu.memory_space<vmem>>, vector<1x10x10xf32>
    %cst = arith.constant dense<0.000000e+00> : vector<10x10xf32>
    %1 = vector.multi_reduction <add>, %0, %cst [0] : vector<1x10x10xf32> to vector<10x10xf32>
    %c0_2 = arith.constant 0 : index
    %c0_3 = arith.constant 0 : index
    %c0_4 = arith.constant 0 : index
    %2 = vector.load %arg2[%c0_2, %c0_3, %c0_4] : memref<1x10x10xf32, #tpu.memory_space<vmem>>, vector<1x10x10xf32>
    %cst_5 = arith.constant dense<0.000000e+00> : vector<10x10xf32>
    %3 = vector.multi_reduction <add>, %2, %cst_5 [0] : vector<1x10x10xf32> to vector<10x10xf32>
    %c0_6 = arith.constant 0 : index
    %c0_7 = arith.constant 0 : index
    %c0_8 = arith.constant 0 : index
    %4 = vector.load %arg3[%c0_6, %c0_7, %c0_8] : memref<1x10x10xf32, #tpu.memory_space<vmem>>, vector<1x10x10xf32>
    %cst_9 = arith.constant dense<0.000000e+00> : vector<10x10xf32>
    %5 = vector.multi_reduction <add>, %4, %cst_9 [0] : vector<1x10x10xf32> to vector<10x10xf32>
    %c0_10 = arith.constant 0 : index
    %c0_11 = arith.constant 0 : index
    %c0_12 = arith.constant 0 : index
    %6 = vector.load %arg4[%c0_10, %c0_11, %c0_12] : memref<1x8x10xf32, #tpu.memory_space<vmem>>, vector<1x8x10xf32>
    %cst_13 = arith.constant dense<0.000000e+00> : vector<8x10xf32>
    %7 = vector.multi_reduction <add>, %6, %cst_13 [0] : vector<1x8x10xf32> to vector<8x10xf32>
    %8 = vector.extract_strided_slice %7 {offsets = [0, 0], sizes = [1, 10], strides = [1, 1]} : vector<8x10xf32> to vector<1x10xf32>
    %9 = tpu.iota {dimensions = array<i32: 0>} : vector<10x10xi32>
    %10 = tpu.iota {dimensions = array<i32: 1>} : vector<10x10xi32>
    %11 = arith.cmpi eq, %9, %10 : vector<10x10xi32>
    %cst_14 = arith.constant 0.000000e+00 : f32
    %12 = vector.broadcast %cst_14 : f32 to vector<10x10xf32>
    %13 = arith.select %11, %3, %12 : vector<10x10xi1>, vector<10x10xf32>
    %cst_15 = arith.constant dense<0.000000e+00> : vector<10xf32>
    %14 = vector.multi_reduction <add>, %13, %cst_15 [1] : vector<10x10xf32> to vector<10xf32>
    %15 = vector.shape_cast %14 : vector<10xf32> to vector<10x1xf32>
    %cst_16 = arith.constant 0.000000e+00 : f32
    %16 = vector.broadcast %cst_16 : f32 to vector<10x10xf32>
    %17 = arith.select %11, %5, %16 : vector<10x10xi1>, vector<10x10xf32>
    %cst_17 = arith.constant dense<0.000000e+00> : vector<10xf32>
    %18 = vector.multi_reduction <add>, %17, %cst_17 [0] : vector<10x10xf32> to vector<10xf32>
    %19 = vector.shape_cast %18 : vector<10xf32> to vector<1x10xf32>
    %cst_18 = arith.constant 1.000000e-24 : f32
    %20 = vector.broadcast %cst_18 : f32 to vector<10x1xf32>
    %21 = arith.maximumf %15, %20 : vector<10x1xf32>
    %22 = math.rsqrt %21 : vector<10x1xf32>
    %cst_19 = arith.constant 1.000000e-24 : f32
    %23 = vector.broadcast %cst_19 : f32 to vector<1x10xf32>
    %24 = arith.maximumf %19, %23 : vector<1x10xf32>
    %25 = math.rsqrt %24 : vector<1x10xf32>
    %26 = vector.broadcast %22 : vector<10x1xf32> to vector<10x10xf32>
    %27 = arith.mulf %1, %26 : vector<10x10xf32>
    %28 = vector.broadcast %25 : vector<1x10xf32> to vector<10x10xf32>
    %29 = arith.mulf %27, %28 : vector<10x10xf32>
    %cst_20 = arith.constant dense<0xFF800000> : vector<10xf32>
    %30 = vector.multi_reduction <maximumf>, %29, %cst_20 [1] : vector<10x10xf32> to vector<10xf32>
    %31 = vector.shape_cast %30 : vector<10xf32> to vector<10x1xf32>
    %32 = vector.broadcast %31 : vector<10x1xf32> to vector<10x10xf32>
    %33 = arith.subf %29, %32 : vector<10x10xf32>
    %34 = math.exp %33 : vector<10x10xf32>
    %cst_21 = arith.constant dense<0.000000e+00> : vector<10xf32>
    %35 = vector.multi_reduction <add>, %34, %cst_21 [1] : vector<10x10xf32> to vector<10xf32>
    %36 = vector.shape_cast %35 : vector<10xf32> to vector<10x1xf32>
    %37 = math.log %36 : vector<10x1xf32>
    %38 = arith.addf %31, %37 : vector<10x1xf32>
    %cst_22 = arith.constant 0.000000e+00 : f32
    %39 = vector.broadcast %cst_22 : f32 to vector<10x10xf32>
    %40 = arith.select %11, %29, %39 : vector<10x10xi1>, vector<10x10xf32>
    %cst_23 = arith.constant dense<0.000000e+00> : vector<10xf32>
    %41 = vector.multi_reduction <add>, %40, %cst_23 [1] : vector<10x10xf32> to vector<10xf32>
    %42 = vector.shape_cast %41 : vector<10xf32> to vector<10x1xf32>
    %43 = arith.subf %38, %42 : vector<10x1xf32>
    %cst_24 = arith.constant dense<0.000000e+00> : vector<1xf32>
    %44 = vector.multi_reduction <add>, %43, %cst_24 [0] : vector<10x1xf32> to vector<1xf32>
    %45 = vector.shape_cast %44 : vector<1xf32> to vector<1x1xf32>
    %cst_25 = arith.constant 1.000000e-01 : f32
    %46 = vector.broadcast %cst_25 : f32 to vector<1x1xf32>
    %47 = arith.mulf %45, %46 : vector<1x1xf32>
    %48 = vector.shape_cast %8 : vector<1x10xf32> to vector<1x1x10xf32>
    %cst_26 = arith.constant dense<0.000000e+00> : vector<1xf32>
    %49 = vector.multi_reduction <add>, %48, %cst_26 [1, 2] : vector<1x1x10xf32> to vector<1xf32>
    %50 = vector.shape_cast %49 : vector<1xf32> to vector<1x1x1xf32>
    %51 = vector.extract %50[0, 0, 0] : f32 from vector<1x1x1xf32>
    %52 = vector.broadcast %51 : f32 to vector<1x10xf32>
    %53 = arith.divf %8, %52 : vector<1x10xf32>
    %cst_27 = arith.constant 0.000000e+00 : f32
    %54 = vector.broadcast %cst_27 : f32 to vector<1x10xf32>
    %55 = arith.cmpf ogt, %53, %54 : vector<1x10xf32>
    %cst_28 = arith.constant 1.000000e-30 : f32
    %56 = vector.broadcast %cst_28 : f32 to vector<1x10xf32>
    %57 = arith.maximumf %53, %56 : vector<1x10xf32>
    %58 = math.log %57 : vector<1x10xf32>
    %59 = arith.mulf %53, %58 : vector<1x10xf32>
    %cst_29 = arith.constant 0.000000e+00 : f32
    %60 = vector.broadcast %cst_29 : f32 to vector<1x10xf32>
    %61 = arith.select %55, %59, %60 : vector<1x10xi1>, vector<1x10xf32>
    %cst_30 = arith.constant dense<0.000000e+00> : vector<1xf32>
    %62 = vector.multi_reduction <add>, %61, %cst_30 [1] : vector<1x10xf32> to vector<1xf32>
    %63 = vector.shape_cast %62 : vector<1xf32> to vector<1x1xf32>
    %cst_31 = arith.constant 2.30258512 : f32
    %64 = vector.broadcast %cst_31 : f32 to vector<1x1xf32>
    %65 = arith.addf %64, %63 : vector<1x1xf32>
    %cst_32 = arith.constant 2.000000e+00 : f32
    %66 = vector.broadcast %cst_32 : f32 to vector<1x1xf32>
    %67 = arith.mulf %66, %65 : vector<1x1xf32>
    %68 = arith.addf %47, %67 : vector<1x1xf32>
    %c0_33 = arith.constant 0 : index
    %c0_34 = arith.constant 0 : index
    %69 = vector.load %arg5[%c0_33, %c0_34] : memref<1x1xf32, #tpu.memory_space<vmem>>, vector<1x1xf32>
    tpu.vector_store %arg5[%c0_33, %c0_34], %68 {strides = array<i32>} : memref<1x1xf32, #tpu.memory_space<vmem>>, vector<1x1xf32>,
    return
  }
  func.func @transform_0(%arg0: i32) -> (i32, i32, i32) {
    %c0_i32 = arith.constant 0 : i32
    %c0_i32_0 = arith.constant 0 : i32
    %c0_i32_1 = arith.constant 0 : i32
    %c0_i32_2 = arith.constant 0 : i32
    return %c0_i32, %c0_i32_0, %c0_i32_1 : i32, i32, i32
  }
  func.func @transform_1(%arg0: i32) -> (i32, i32, i32) {
    %c0_i32 = arith.constant 0 : i32
    %c0_i32_0 = arith.constant 0 : i32
    %c0_i32_1 = arith.constant 0 : i32
    %c0_i32_2 = arith.constant 0 : i32
    return %c0_i32, %c0_i32_0, %c0_i32_1 : i32, i32, i32
  }
  func.func @transform_2(%arg0: i32) -> (i32, i32, i32) {
    %c0_i32 = arith.constant 0 : i32
    %c0_i32_0 = arith.constant 0 : i32
    %c0_i32_1 = arith.constant 0 : i32
    %c0_i32_2 = arith.constant 0 : i32
    return %c0_i32, %c0_i32_0, %c0_i32_1 : i32, i32, i32
  }
  func.func @transform_3(%arg0: i32) -> (i32, i32, i32) {
    %c0_i32 = arith.constant 0 : i32
    %c0_i32_0 = arith.constant 0 : i32
    %c0_i32_1 = arith.constant 0 : i32
    %c0_i32_2 = arith.constant 0 : i32
    return %c0_i32, %c0_i32_0, %c0_i32_1 : i32, i32, i32
  }
  func.func @transform_4(%arg0: i32) -> (i32, i32) {
    %c0_i32 = arith.constant 0 : i32
    %c0_i32_0 = arith.constant 0 : i32
    %c0_i32_1 = arith.constant 0 : i32
    return %c0_i32, %c0_i32_0 : i32, i32
  }
}

module attributes {stable_mosaic.version = 11 : i64} {
  func.func @_pui_partials_kernel(%arg0: i32, %arg1: i32, %arg2: memref<16x10xf32, #tpu.memory_space<vmem>>, %arg3: memref<16x10xf32, #tpu.memory_space<vmem>>, %arg4: memref<1x10x10xf32, #tpu.memory_space<vmem>>, %arg5: memref<1x10x10xf32, #tpu.memory_space<vmem>>, %arg6: memref<1x10x10xf32, #tpu.memory_space<vmem>>, %arg7: memref<1x8x10xf32, #tpu.memory_space<vmem>>, %arg8: memref<10x10xf32, #tpu.memory_space<vmem>>, %arg9: memref<10x10xf32, #tpu.memory_space<vmem>>, %arg10: memref<10x10xf32, #tpu.memory_space<vmem>>, %arg11: memref<8x10xf32, #tpu.memory_space<vmem>>, %arg12: memref<8x16xf32, #tpu.memory_space<vmem>>) attributes {dimension_semantics = [#tpu.dimension_semantics<parallel>, #tpu.dimension_semantics<arbitrary>], iteration_bounds = array<i64: 1, 1>, scalar_prefetch = 0 : i64, scratch_operands = 5 : i64, tpu.core_type = #tpu.core_type<tc>, window_params = [{transform_indices = @transform_0, window_bounds = array<i64: 16, 10>}, {transform_indices = @transform_1, window_bounds = array<i64: 16, 10>}, {transform_indices = @transform_2, window_bounds = array<i64: 1, 10, 10>}, {transform_indices = @transform_3, window_bounds = array<i64: 1, 10, 10>}, {transform_indices = @transform_4, window_bounds = array<i64: 1, 10, 10>}, {transform_indices = @transform_5, window_bounds = array<i64: 1, 8, 10>}]} {
    %c0_i32 = arith.constant 0 : i32
    %0 = arith.cmpi eq, %arg1, %c0_i32 : i32
    %1 = arith.extui %0 : i1 to i32
    %c0_i32_0 = arith.constant 0 : i32
    %2 = arith.cmpi ne, %1, %c0_i32_0 : i32
    scf.if %2 {
      %cst_27 = arith.constant 0.000000e+00 : f32
      %25 = vector.broadcast %cst_27 : f32 to vector<10x10xf32>
      %c0_28 = arith.constant 0 : index
      %c0_29 = arith.constant 0 : index
      %26 = vector.load %arg8[%c0_28, %c0_29] : memref<10x10xf32, #tpu.memory_space<vmem>>, vector<10x10xf32>
      tpu.vector_store %arg8[%c0_28, %c0_29], %25 {strides = array<i32>} : memref<10x10xf32, #tpu.memory_space<vmem>>, vector<10x10xf32>,
      %cst_30 = arith.constant 0.000000e+00 : f32
      %27 = vector.broadcast %cst_30 : f32 to vector<10x10xf32>
      %c0_31 = arith.constant 0 : index
      %c0_32 = arith.constant 0 : index
      %28 = vector.load %arg9[%c0_31, %c0_32] : memref<10x10xf32, #tpu.memory_space<vmem>>, vector<10x10xf32>
      tpu.vector_store %arg9[%c0_31, %c0_32], %27 {strides = array<i32>} : memref<10x10xf32, #tpu.memory_space<vmem>>, vector<10x10xf32>,
      %cst_33 = arith.constant 0.000000e+00 : f32
      %29 = vector.broadcast %cst_33 : f32 to vector<10x10xf32>
      %c0_34 = arith.constant 0 : index
      %c0_35 = arith.constant 0 : index
      %30 = vector.load %arg10[%c0_34, %c0_35] : memref<10x10xf32, #tpu.memory_space<vmem>>, vector<10x10xf32>
      tpu.vector_store %arg10[%c0_34, %c0_35], %29 {strides = array<i32>} : memref<10x10xf32, #tpu.memory_space<vmem>>, vector<10x10xf32>,
      %cst_36 = arith.constant 0.000000e+00 : f32
      %31 = vector.broadcast %cst_36 : f32 to vector<8x10xf32>
      %c0_37 = arith.constant 0 : index
      %c0_38 = arith.constant 0 : index
      %32 = vector.load %arg11[%c0_37, %c0_38] : memref<8x10xf32, #tpu.memory_space<vmem>>, vector<8x10xf32>
      tpu.vector_store %arg11[%c0_37, %c0_38], %31 {strides = array<i32>} : memref<8x10xf32, #tpu.memory_space<vmem>>, vector<8x10xf32>,
      %cst_39 = arith.constant 1.000000e+00 : f32
      %33 = vector.broadcast %cst_39 : f32 to vector<8x16xf32>
      %c0_40 = arith.constant 0 : index
      %c0_41 = arith.constant 0 : index
      %34 = vector.load %arg12[%c0_40, %c0_41] : memref<8x16xf32, #tpu.memory_space<vmem>>, vector<8x16xf32>
      tpu.vector_store %arg12[%c0_40, %c0_41], %33 {strides = array<i32>} : memref<8x16xf32, #tpu.memory_space<vmem>>, vector<8x16xf32>,
    } else {
    }
    %c0 = arith.constant 0 : index
    %c0_1 = arith.constant 0 : index
    %3 = vector.load %arg2[%c0, %c0_1] : memref<16x10xf32, #tpu.memory_space<vmem>>, vector<16x10xf32>
    %c0_2 = arith.constant 0 : index
    %c0_3 = arith.constant 0 : index
    %4 = vector.load %arg3[%c0_2, %c0_3] : memref<16x10xf32, #tpu.memory_space<vmem>>, vector<16x10xf32>
    %c0_4 = arith.constant 0 : index
    %c0_5 = arith.constant 0 : index
    %5 = vector.load %arg8[%c0_4, %c0_5] : memref<10x10xf32, #tpu.memory_space<vmem>>, vector<10x10xf32>
    %cst = arith.constant dense<0.000000e+00> : vector<10x10xf32>
    %6 = tpu.matmul %3, %4, %cst {dimension_numbers = #tpu.dot_dimension_numbers<[0], [0], [1], [1], [0, 1, 1, 1], [], []>} : vector<16x10xf32>, vector<16x10xf32>, vector<10x10xf32> -> vector<10x10xf32>
    %7 = arith.addf %5, %6 : vector<10x10xf32>
    %c0_6 = arith.constant 0 : index
    %c0_7 = arith.constant 0 : index
    %8 = vector.load %arg8[%c0_6, %c0_7] : memref<10x10xf32, #tpu.memory_space<vmem>>, vector<10x10xf32>
    tpu.vector_store %arg8[%c0_6, %c0_7], %7 {strides = array<i32>} : memref<10x10xf32, #tpu.memory_space<vmem>>, vector<10x10xf32>,
    %c0_8 = arith.constant 0 : index
    %c0_9 = arith.constant 0 : index
    %9 = vector.load %arg9[%c0_8, %c0_9] : memref<10x10xf32, #tpu.memory_space<vmem>>, vector<10x10xf32>
    %cst_10 = arith.constant dense<0.000000e+00> : vector<10x10xf32>
    %10 = tpu.matmul %3, %3, %cst_10 {dimension_numbers = #tpu.dot_dimension_numbers<[0], [0], [1], [1], [0, 1, 1, 1], [], []>} : vector<16x10xf32>, vector<16x10xf32>, vector<10x10xf32> -> vector<10x10xf32>
    %11 = arith.addf %9, %10 : vector<10x10xf32>
    %c0_11 = arith.constant 0 : index
    %c0_12 = arith.constant 0 : index
    %12 = vector.load %arg9[%c0_11, %c0_12] : memref<10x10xf32, #tpu.memory_space<vmem>>, vector<10x10xf32>
    tpu.vector_store %arg9[%c0_11, %c0_12], %11 {strides = array<i32>} : memref<10x10xf32, #tpu.memory_space<vmem>>, vector<10x10xf32>,
    %c0_13 = arith.constant 0 : index
    %c0_14 = arith.constant 0 : index
    %13 = vector.load %arg10[%c0_13, %c0_14] : memref<10x10xf32, #tpu.memory_space<vmem>>, vector<10x10xf32>
    %cst_15 = arith.constant dense<0.000000e+00> : vector<10x10xf32>
    %14 = tpu.matmul %4, %4, %cst_15 {dimension_numbers = #tpu.dot_dimension_numbers<[0], [0], [1], [1], [0, 1, 1, 1], [], []>} : vector<16x10xf32>, vector<16x10xf32>, vector<10x10xf32> -> vector<10x10xf32>
    %15 = arith.addf %13, %14 : vector<10x10xf32>
    %c0_16 = arith.constant 0 : index
    %c0_17 = arith.constant 0 : index
    %16 = vector.load %arg10[%c0_16, %c0_17] : memref<10x10xf32, #tpu.memory_space<vmem>>, vector<10x10xf32>
    tpu.vector_store %arg10[%c0_16, %c0_17], %15 {strides = array<i32>} : memref<10x10xf32, #tpu.memory_space<vmem>>, vector<10x10xf32>,
    %c0_18 = arith.constant 0 : index
    %c0_19 = arith.constant 0 : index
    %17 = vector.load %arg11[%c0_18, %c0_19] : memref<8x10xf32, #tpu.memory_space<vmem>>, vector<8x10xf32>
    %c0_20 = arith.constant 0 : index
    %c0_21 = arith.constant 0 : index
    %18 = vector.load %arg12[%c0_20, %c0_21] : memref<8x16xf32, #tpu.memory_space<vmem>>, vector<8x16xf32>
    %cst_22 = arith.constant dense<0.000000e+00> : vector<8x10xf32>
    %19 = tpu.matmul %18, %3, %cst_22 {dimension_numbers = #tpu.dot_dimension_numbers<[1], [0], [0], [1], [0, 0, 1, 1], [], []>} : vector<8x16xf32>, vector<16x10xf32>, vector<8x10xf32> -> vector<8x10xf32>
    %20 = arith.addf %17, %19 : vector<8x10xf32>
    %c0_23 = arith.constant 0 : index
    %c0_24 = arith.constant 0 : index
    %21 = vector.load %arg11[%c0_23, %c0_24] : memref<8x10xf32, #tpu.memory_space<vmem>>, vector<8x10xf32>
    tpu.vector_store %arg11[%c0_23, %c0_24], %20 {strides = array<i32>} : memref<8x10xf32, #tpu.memory_space<vmem>>, vector<8x10xf32>,
    %c0_i32_25 = arith.constant 0 : i32
    %22 = arith.cmpi eq, %arg1, %c0_i32_25 : i32
    %23 = arith.extui %22 : i1 to i32
    %c0_i32_26 = arith.constant 0 : i32
    %24 = arith.cmpi ne, %23, %c0_i32_26 : i32
    scf.if %24 {
      %c0_27 = arith.constant 0 : index
      %c0_28 = arith.constant 0 : index
      %25 = vector.load %arg8[%c0_27, %c0_28] : memref<10x10xf32, #tpu.memory_space<vmem>>, vector<10x10xf32>
      %c0_29 = arith.constant 0 : index
      %c0_30 = arith.constant 0 : index
      %c0_31 = arith.constant 0 : index
      %26 = vector.load %arg4[%c0_29, %c0_30, %c0_31] : memref<1x10x10xf32, #tpu.memory_space<vmem>>, vector<1x10x10xf32>
      %27 = vector.shape_cast %26 : vector<1x10x10xf32> to vector<10x10xf32>
      %28 = vector.shape_cast %25 : vector<10x10xf32> to vector<1x10x10xf32>
      tpu.vector_store %arg4[%c0_29, %c0_30, %c0_31], %28 {strides = array<i32>} : memref<1x10x10xf32, #tpu.memory_space<vmem>>, vector<1x10x10xf32>,
      %c0_32 = arith.constant 0 : index
      %c0_33 = arith.constant 0 : index
      %29 = vector.load %arg9[%c0_32, %c0_33] : memref<10x10xf32, #tpu.memory_space<vmem>>, vector<10x10xf32>
      %c0_34 = arith.constant 0 : index
      %c0_35 = arith.constant 0 : index
      %c0_36 = arith.constant 0 : index
      %30 = vector.load %arg5[%c0_34, %c0_35, %c0_36] : memref<1x10x10xf32, #tpu.memory_space<vmem>>, vector<1x10x10xf32>
      %31 = vector.shape_cast %30 : vector<1x10x10xf32> to vector<10x10xf32>
      %32 = vector.shape_cast %29 : vector<10x10xf32> to vector<1x10x10xf32>
      tpu.vector_store %arg5[%c0_34, %c0_35, %c0_36], %32 {strides = array<i32>} : memref<1x10x10xf32, #tpu.memory_space<vmem>>, vector<1x10x10xf32>,
      %c0_37 = arith.constant 0 : index
      %c0_38 = arith.constant 0 : index
      %33 = vector.load %arg10[%c0_37, %c0_38] : memref<10x10xf32, #tpu.memory_space<vmem>>, vector<10x10xf32>
      %c0_39 = arith.constant 0 : index
      %c0_40 = arith.constant 0 : index
      %c0_41 = arith.constant 0 : index
      %34 = vector.load %arg6[%c0_39, %c0_40, %c0_41] : memref<1x10x10xf32, #tpu.memory_space<vmem>>, vector<1x10x10xf32>
      %35 = vector.shape_cast %34 : vector<1x10x10xf32> to vector<10x10xf32>
      %36 = vector.shape_cast %33 : vector<10x10xf32> to vector<1x10x10xf32>
      tpu.vector_store %arg6[%c0_39, %c0_40, %c0_41], %36 {strides = array<i32>} : memref<1x10x10xf32, #tpu.memory_space<vmem>>, vector<1x10x10xf32>,
      %c0_42 = arith.constant 0 : index
      %c0_43 = arith.constant 0 : index
      %37 = vector.load %arg11[%c0_42, %c0_43] : memref<8x10xf32, #tpu.memory_space<vmem>>, vector<8x10xf32>
      %c0_44 = arith.constant 0 : index
      %c0_45 = arith.constant 0 : index
      %c0_46 = arith.constant 0 : index
      %38 = vector.load %arg7[%c0_44, %c0_45, %c0_46] : memref<1x8x10xf32, #tpu.memory_space<vmem>>, vector<1x8x10xf32>
      %39 = vector.shape_cast %38 : vector<1x8x10xf32> to vector<8x10xf32>
      %40 = vector.shape_cast %37 : vector<8x10xf32> to vector<1x8x10xf32>
      tpu.vector_store %arg7[%c0_44, %c0_45, %c0_46], %40 {strides = array<i32>} : memref<1x8x10xf32, #tpu.memory_space<vmem>>, vector<1x8x10xf32>,
    } else {
    }
    return
  }
  func.func @transform_0(%arg0: i32, %arg1: i32) -> (i32, i32) {
    %c1_i32 = arith.constant 1 : i32
    %0 = arith.muli %arg0, %c1_i32 : i32
    %1 = arith.addi %0, %arg1 : i32
    %c0_i32 = arith.constant 0 : i32
    %c0_i32_0 = arith.constant 0 : i32
    return %1, %c0_i32 : i32, i32
  }
  func.func @transform_1(%arg0: i32, %arg1: i32) -> (i32, i32) {
    %c1_i32 = arith.constant 1 : i32
    %0 = arith.muli %arg0, %c1_i32 : i32
    %1 = arith.addi %0, %arg1 : i32
    %c0_i32 = arith.constant 0 : i32
    %c0_i32_0 = arith.constant 0 : i32
    return %1, %c0_i32 : i32, i32
  }
  func.func @transform_2(%arg0: i32, %arg1: i32) -> (i32, i32, i32) {
    %c0_i32 = arith.constant 0 : i32
    %c0_i32_0 = arith.constant 0 : i32
    %c0_i32_1 = arith.constant 0 : i32
    return %arg0, %c0_i32, %c0_i32_0 : i32, i32, i32
  }
  func.func @transform_3(%arg0: i32, %arg1: i32) -> (i32, i32, i32) {
    %c0_i32 = arith.constant 0 : i32
    %c0_i32_0 = arith.constant 0 : i32
    %c0_i32_1 = arith.constant 0 : i32
    return %arg0, %c0_i32, %c0_i32_0 : i32, i32, i32
  }
  func.func @transform_4(%arg0: i32, %arg1: i32) -> (i32, i32, i32) {
    %c0_i32 = arith.constant 0 : i32
    %c0_i32_0 = arith.constant 0 : i32
    %c0_i32_1 = arith.constant 0 : i32
    return %arg0, %c0_i32, %c0_i32_0 : i32, i32, i32
  }
  func.func @transform_5(%arg0: i32, %arg1: i32) -> (i32, i32, i32) {
    %c0_i32 = arith.constant 0 : i32
    %c0_i32_0 = arith.constant 0 : i32
    %c0_i32_1 = arith.constant 0 : i32
    return %arg0, %c0_i32, %c0_i32_0 : i32, i32, i32
  }
}

</mosaic_0001>

<bundles_post_ra>
// kernel: pui_loss.3
= control target key start
LH: loop header
LB: loop body
LE: loop exit
PB: predicated region body
PF: predicated region fallthrough
CT: control target
= control target key end

     0   :  { %v32_v0 = vlaneseq  ;;  %vm114_vm0 = vcmask 73728   ;;  %s305_s0 = inlined_call_operand.vmem [shape: f32[1,10,10], index: 0, kind: input, shape index: {}]   ;;  %s306_s1 = inlined_call_operand.vmem [shape: f32[1,10,10], index: 1, kind: input, shape index: {}]   ;;  %s307_s2 = inlined_call_operand.vmem [shape: f32[1,10,10], index: 2, kind: input, shape index: {}]   ;;  %s308_s3 = inlined_call_operand.vmem [shape: f32[1,8,10], index: 3, kind: input, shape index: {}]   ;;  %s309_s4 = inlined_call_operand.hbm [shape: f32[1,1], index: 4, kind: output, shape index: {}]  }
   0x1   :  { %v230_v1 = vld [vmem:[%s308_s3] sm:$0xff] }
   0x2   :  { %9 = vsyncpa [#allocation3], 0  ;;  %v232_v2 = vshrl.u32 %v32_v0, 7  ;;  %v234_v3 = vand.u32 127, %v32_v0  ;;  %v115_v4 = vsel %vm114_vm0, %v230_v1, 0.0  ;;  %v22_v7 = vld [vmem:[%s306_s1] sm:$0xff] }
   0x3   :  { %116 = vadd.xlane.f32.xlu1 %v115_v4  ;;  %v23_v5 = vld [vmem:[%s306_s1 + $0x8] sm:$0x3]  ;;  %vm45_vm2 = vcmask 74752   ;;  %vm41_vm4 = vcmask 80896   ;;  %v26_v13 = vld [vmem:[%s307_s2] sm:$0xff]  ;;  %vm104_vm6 = vcmask 1041408  }
   0x4   :  { %v242_v6 = vadd.s32 8, %v232_v2  ;;  %vm37_vm1 = vcmp.eq.s32.totalorder %v232_v2, %v234_v3  ;;  %v27_v12 = vld [vmem:[%s307_s2 + $0x8] sm:$0x3]  ;;  %v18_v41 = vld [vmem:[%s305_s0] sm:$0xff]  ;;  %vm140_vm7 = vcmask 0  }
   0x5   :  { %v39_v9 = vsel %vm37_vm1, %v22_v7, 0.0  ;;  %v49_v15 = vsel %vm37_vm1, %v26_v13, 0.0  ;;  %v19_v37 = vld [vmem:[%s305_s0 + $0x8] sm:$0x3]  ;;  %s201_s0 = smov [#allocation2]  }
   0x6   :  { %vm38_vm3 = vcmp.eq.s32.totalorder %v242_v6, %v234_v3  ;;  %v42_v11 = vsel %vm41_vm4, %v39_v9, 0.0  ;;  %v51_v17 = vsel %vm41_vm4, %v49_v15, 0.0  ;;  %s148_s27 = sshll.u32 %s201_s0, 4  ;;  %s149_s27 = int_to_ptr.vmem [resolvable:$true] %s148_s27 }
   0x7   :  { %v40_v8 = vsel %vm38_vm3, %v23_v5, 0.0  ;;  %v50_v14 = vsel %vm38_vm3, %v27_v12, 0.0  ;;  %s177_s28 = scalar_lea.vmem %s149_s27, 16  ;;  %s181_s29 = scalar_lea.vmem %s149_s27, 32 }
   0x8   :  { %v46_v10 = vsel %vm45_vm2, %v40_v8, 0.0  ;;  %v52_v16 = vsel %vm45_vm2, %v50_v14, 0.0  ;;  %p178_p0 = scmp.ne.s32.totalorder %s149_s27, %s177_s28  ;;  %p182_p1 = scmp.lt.s32.totalorder %s149_s27, %s149_s27 }
   0x9   :  { %47 = vadd.xlane.f32.xlu0 %v46_v10  ;;  %v53_v18 = vadd.f32 %v52_v16, %v51_v17  ;;  %p183_p2 = scmp.lt.s32.totalorder %s181_s29, %s177_s28 }
   0xb   :  { %v54_v19 = vrot.slane %v53_v18, 4  ;;  %p184_p3 = por %p183_p2, %p182_p1 }
   0xd   :  { %43 = vadd.xlane.f32.xlu0 %v42_v11  ;;  %v55_v20 = vadd.f32 %v54_v19, %v53_v18  ;;  %p185_p4 = pnand %p184_p3, %p178_p0 }
   0xf   :  { %v56_v21 = vrot.slane %v55_v20, 2 }
  0x11   :  { %v57_v22 = vadd.f32 %v56_v21, %v55_v20 }
  0x13   :  { %v58_v23 = vrot.slane %v57_v22, 1 }
  0x15   :  { %v59_v24 = vadd.f32 %v58_v23, %v57_v22 }
  0x17   :  { %v64_v28 = vmax.f32 %v59_v24, 1e-24 }
  0x19   :  { %159 = vrsqrt.f32 %v64_v28 }
  0x23   :  { %v160_v38 = vpop.eup %159 }
  0x90   :  { %v117_v25 = vpop.xlane.xlu1 %116 }
  0x91   :  { %v118_v26 = vrot.slane %v117_v25, 4 }
  0x93   :  { %v119_v27 = vadd.f32 %v118_v26, %v117_v25 }
  0x95   :  { %v120_v29 = vrot.slane %v119_v27, 2 }
  0x96   :  { %v48_v30 = vpop.xlane.xlu0 %47 }
  0x97   :  { %v61_v31 = vmax.f32 %v48_v30, 1e-24  ;;  %v121_v32 = vadd.f32 %v120_v29, %v119_v27 }
  0x99   :  { %161 = vrsqrt.f32 %v61_v31  ;;  %v122_v33 = vrot.slane %v121_v32, 1 }
  0x9a   :  { %v44_v34 = vpop.xlane.xlu0 %43 }
  0x9b   :  { %v60_v35 = vmax.f32 %v44_v34, 1e-24  ;;  %v123_v36 = vadd.f32 %v122_v33, %v121_v32 }
  0x9d   :  { %163 = vrsqrt.f32 %v60_v35  ;;  %156 = vpush %v123_v36 }
  0xa3   :  { %v162_v39 = vpop.eup %161 }
  0xa4   :  { %v67_v40 = vmul.f32 %v162_v39, %v19_v37 }
  0xa6   :  { %v69_v42 = vmul.f32 %v160_v38, %v67_v40 }
  0xa7   :  { %v164_v43 = vpop.eup %163 }
  0xa8   :  { %v73_v44 = vsel %vm45_vm2, %v69_v42, -inf  ;;  %v66_v45 = vmul.f32 %v164_v43, %v18_v41  ;;  %v95_v63 = vsel %vm38_vm3, %v69_v42, 0.0 }
  0xa9   :  { %74 = vmax.xlane.f32.xlu1 %v73_v44  ;;  %v99_v4 = vsel %vm45_vm2, %v95_v63, 0.0 }
  0xaa   :  { %v68_v46 = vmul.f32 %v160_v38, %v66_v45 }
  0xac   :  { %v70_v47 = vsel %vm41_vm4, %v68_v46, -inf  ;;  %v94_v7 = vsel %vm37_vm1, %v68_v46, 0.0 }
  0xad   :  { %71 = vmax.xlane.f32.xlu0 %v70_v47  ;;  %v96_v9 = vsel %vm41_vm4, %v94_v7, 0.0 }
  0xce   :  { %s157_s26 = spop %156 }
  0xcf   :  { %v125_v48 = vstv %s157_s26 }
  0xd0   :  { %165 = vrcp.f32 %v125_v48 }
  0xda   :  { %v166_v49 = vpop.eup %165 }
  0xdb   :  { %v127_v50 = vmul.f32 %v166_v49, %v230_v1 }
  0xdd   :  { %v129_v51 = vmax.f32 %v127_v50, 1e-30  ;;  %vm128_vm5 = vcmp.gt.f32.partialorder %v127_v50, 0.0 }
  0xdf   :  { %167 = vlog2.f32 %v129_v51 }
  0xe9   :  { %v168_v58 = vpop.eup %167 }
  0xea   :  { %v131_v59 = vmul.f32 0.6931472, %v168_v58 }
  0xec   :  { %v132_v61 = vmul.f32 %v131_v59, %v127_v50 }
  0xee   :  { %v133_v1 = vsel %vm128_vm5, %v132_v61, 0.0 }
  0xef   :  { %v134_v8 = vsel %vm114_vm0, %v133_v1, 0.0 }
 0x136   :  { %v75_v52 = vpop.xlane.xlu1 %74 }
 0x137   :  { %v77_v53 = vsub.f32 %v69_v42, %v75_v52 }
 0x139   :  { %v80_v54 = vmul.f32 1.442695, %v77_v53 }
 0x13a   :  { %v72_v55 = vpop.xlane.xlu0 %71 }
 0x13b   :  { %169 = vpow2.f32 %v80_v54  ;;  %v76_v56 = vsub.f32 %v68_v46, %v72_v55 }
 0x13d   :  { %v78_v57 = vmul.f32 1.442695, %v76_v56 }
 0x13f   :  { %171 = vpow2.f32 %v78_v57 }
 0x145   :  { %v170_v60 = vpop.eup %169 }
 0x146   :  { %v85_v62 = vsel %vm45_vm2, %v170_v60, 0.0 }
 0x147   :  { %86 = vadd.xlane.f32.xlu1 %v85_v62 }
 0x149   :  { %v172_v0 = vpop.eup %171 }
 0x14a   :  { %v82_v5 = vsel %vm41_vm4, %v172_v0, 0.0 }
 0x14b   :  { %100 = vadd.xlane.f32.xlu1 %v99_v4  ;;  %83 = vadd.xlane.f32.xlu0 %v82_v5 }
 0x14f   :  { %97 = vadd.xlane.f32.xlu0 %v96_v9  ;;  %135 = vadd.xlane.f32.xlu1 %v134_v8 }
 0x1d4   :  { %v87_v6 = vpop.xlane.xlu1 %86 }
 0x1d5   :  { %173 = vlog2.f32 %v87_v6 }
 0x1d8   :  { %v84_v10 = vpop.xlane.xlu0 %83  ;;  %v101_v15 = vpop.xlane.xlu1 %100 }
 0x1d9   :  { %175 = vlog2.f32 %v84_v10 }
 0x1dc   :  { %v98_v3 = vpop.xlane.xlu0 %97  ;;  %v136_v24 = vpop.xlane.xlu1 %135 }
 0x1dd   :  { %v137_v27 = vadd.f32 2.3025851, %v136_v24 }
 0x1df   :  { %v174_v11 = vpop.eup %173  ;;  %v138_v30 = vmul.f32 2.0, %v137_v27 }
 0x1e0   :  { %v91_v12 = vmul.f32 0.6931472, %v174_v11 }
 0x1e2   :  { %v93_v13 = vadd.f32 %v91_v12, %v75_v52 }
 0x1e3   :  { %v176_v14 = vpop.eup %175 }
 0x1e4   :  { %v89_v16 = vmul.f32 0.6931472, %v176_v14  ;;  %v103_v17 = vsub.f32 %v93_v13, %v101_v15 }
 0x1e6   :  { %v92_v2 = vadd.f32 %v89_v16, %v72_v55  ;;  %v105_v19 = vsel %vm104_vm6, %v103_v17, 0.0 }
 0x1e8   :  { %v102_v18 = vsub.f32 %v92_v2, %v98_v3 }
 0x1ea   :  { %v106_v20 = vadd.f32 %v105_v19, %v102_v18 }
 0x1ec   :  { %v107_v21 = vrot.slane %v106_v20, 4 }
 0x1ee   :  { %v108_v22 = vadd.f32 %v107_v21, %v106_v20 }
 0x1f0   :  { %v109_v23 = vrot.slane %v108_v22, 2 }
 0x1f2   :  { %v110_v25 = vadd.f32 %v109_v23, %v108_v22 }
 0x1f4   :  { %v111_v26 = vrot.slane %v110_v25, 1 }
 0x1f6   :  { %v112_v28 = vadd.f32 %v111_v26, %v110_v25 }
 0x1f8   :  { %v113_v29 = vmul.f32 0.1, %v112_v28 }
 0x1fa   :  { %v139_v31 = vadd.f32 %v138_v30, %v113_v29 }
 0x1fc   :  { %141 = vst.msk [vmem:[#allocation2] sm:$0x1] %vm140_vm7, %v139_v31 }
 0x1fd   :  { %188 = shalt.err (!%p185_p4)
}
 0x1fe   :  { %s189_s6 = scalar_lea.hbm %s309_s4, 16 }
 0x1ff   :  { %p190_p5 = scmp.ne.s32.totalorder %s309_s4, %s189_s6  ;;  %p193_p6 = scmp.lt.u32.totalorder %s189_s6, %s309_s4 }
 0x201   :  { %p195_p7 = pnand %p193_p6, %p190_p5 }
 0x203   :  { %198 = shalt.err (!%p195_p7)
}
 0x204   :  { %151 = dma.vmem_to_hbm [thread:$0]  %s149_s27, 16, %s309_s4, [#allocation3]  }
 0x205   :  { %199 = dma.done.wait [#allocation3], 16  }
 0x206   :  { %200 = vsyncadd [#allocation3], 4294967280 }
 0x207   :  { %155 = vsyncpa [#allocation3], 1 }

// kernel: pui_loss.2
= control target key start
LH: loop header
LB: loop body
LE: loop exit
PB: predicated region body
PF: predicated region fallthrough
CT: control target
= control target key end

     0   :  { %11 = vsyncpa [#allocation8], 0  ;;  %s741_s0 = inlined_call_operand.hbm [shape: f32[16,10], index: 0, kind: input, shape index: {}]   ;;  %s742_s1 = inlined_call_operand.hbm [shape: f32[16,10], index: 1, kind: input, shape index: {}]   ;;  %s743_s2 = inlined_call_operand.vmem [shape: f32[1,10,10], index: 2, kind: output, shape index: {0}]   ;;  %s744_s3 = inlined_call_operand.vmem [shape: f32[1,10,10], index: 3, kind: output, shape index: {1}]   ;;  %s745_s4 = inlined_call_operand.vmem [shape: f32[1,10,10], index: 4, kind: output, shape index: {2}]   ;;  %s746_s5 = inlined_call_operand.vmem [shape: f32[1,8,10], index: 5, kind: output, shape index: {3}]  }
   0x1   :  { %12 = vsyncpa [#allocation10], 0  ;;  %s629_s18 = smov [#allocation7]   ;;  %s581_s22 = scalar_lea.hbm %s741_s0, 256 }
   0x2   :  { %s22_s19 = sshll.u32 %s629_s18, 4  ;;  %p582_p0 = scmp.ne.s32.totalorder %s741_s0, %s581_s22  ;;  %s23_s19 = int_to_ptr.vmem [resolvable:$true] %s22_s19 }
   0x3   :  { %p585_p1 = scmp.lt.u32.totalorder %s581_s22, %s741_s0 }
   0x5   :  { %p587_p2 = pnand %p585_p1, %p582_p0 }
   0x7   :  { %590 = shalt.err (!%p587_p2)
}
   0x8   :  { %s591_s27 = scalar_lea.vmem %s23_s19, 256  ;;  %p596_p4 = scmp.lt.s32.totalorder %s23_s19, %s23_s19 }
   0x9   :  { %p592_p3 = scmp.ne.s32.totalorder %s23_s19, %s591_s27  ;;  %p597_p5 = scmp.lt.s32.totalorder %s591_s27, %s591_s27 }
   0xb   :  { %p598_p6 = por %p597_p5, %p596_p4 }
   0xd   :  { %p599_p7 = pnand %p598_p6, %p592_p3 }
   0xf   :  { %602 = shalt.err (!%p599_p7)
}
  0x10   :  { %s630_s28 = smov 128   ;;  %s631_s29 = smov 8  }
  0x11   :  { %28 = dma.hbm_to_vmem [thread:$0]  %s741_s0, 256, %s23_s19, [#allocation8], %s630_s28, %s630_s28, %s631_s29  }
  0x12   :  { %s632_s7 = smov [#allocation9]   ;;  %s603_s11 = scalar_lea.hbm %s742_s1, 256 }
  0x13   :  { %s38_s8 = sshll.u32 %s632_s7, 4  ;;  %p604_p8 = scmp.ne.s32.totalorder %s742_s1, %s603_s11  ;;  %s39_s8 = int_to_ptr.vmem [resolvable:$true] %s38_s8 }
  0x14   :  { %p607_p9 = scmp.lt.u32.totalorder %s603_s11, %s742_s1 }
  0x16   :  { %p609_p10 = pnand %p607_p9, %p604_p8 }
  0x18   :  { %612 = shalt.err (!%p609_p10)
}
  0x19   :  { %s613_s16 = scalar_lea.vmem %s39_s8, 256  ;;  %p618_p12 = scmp.lt.s32.totalorder %s39_s8, %s39_s8 }
  0x1a   :  { %p614_p11 = scmp.ne.s32.totalorder %s39_s8, %s613_s16  ;;  %p619_p13 = scmp.lt.s32.totalorder %s613_s16, %s613_s16 }
  0x1c   :  { %p620_p0 = por %p619_p13, %p618_p12 }
  0x1e   :  { %p621_p1 = pnand %p620_p0, %p614_p11 }
  0x20   :  { %624 = shalt.err (!%p621_p1)
}
  0x21   :  { %44 = dma.hbm_to_vmem [thread:$0]  %s742_s1, 256, %s39_s8, [#allocation10], %s630_s28, %s630_s28, %s631_s29  }
  0x22   :  { %625 = dma.done.wait [#allocation8], 256  }
  0x23   :  { %626 = vsyncadd [#allocation8], 4294967040 }
  0x24   :  { %627 = dma.done.wait [#allocation10], 256  }
  0x25   :  { %628 = vsyncadd [#allocation10], 4294967040  ;;  %v70_v0 = vld [vmem:[#allocation7] sm:$0xff]  ;;  %v72_v1 = vld [vmem:[#allocation9] sm:$0xff]  ;;  %vm68_vm0 = vcmask 130048   ;;  %v633_v6 = vmov 1.0  }
  0x26   :  { %v71_v2 = vld [vmem:[#allocation7 + $0x8] sm:$0xff]  ;;  %76 = vxpose.xlu0.b32.start [1/2] (short) (narrow) %v70_v0, 16  ;;  %279 = vxpose.xlu1.b32.start [1/2] (short) (narrow) %v72_v1, 16  ;;  %v73_v4 = vld [vmem:[#allocation9 + $0x8] sm:$0xff]  ;;  %69 = vst.msk [vmem:[#allocation6] sm:$0xff] %vm68_vm0, %v633_v6  ;;  %v634_v7 = vmov 0.0|0.0  }
  0x27   :  { %v562_v3 = vpack.c.bf16 %v71_v2, %v70_v0  ;;  %v558_v5 = vpack.c.bf16 %v73_v4, %v72_v1  ;;  %vm61_vm1 = vcmask 74752   ;;  %v635_v8 = vmov 0.0  }
  0x28   :  { %62 = vst.msk [vmem:[#allocation2 + $0x8] sm:$0x3] %vm61_vm1, %v635_v8  ;;  %64 = vst.msk [vmem:[#allocation3 + $0x8] sm:$0x3] %vm61_vm1, %v635_v8  ;;  %vm636_vm2 = vmmov 0   ;;  %vm59_vm3 = vcmask 80896  }
  0x29   :  { %563 = vmatprep.subr.bf16.mxu1 %v562_v3  ;;  %559 = vmatprep.subr.bf16.mxu0 %v558_v5  ;;  %66 = vst.msk [vmem:[#allocation4 + $0x8] sm:$0x3] %vm61_vm1, %v635_v8 }
  0x2a   :  { %565 = vmatpush3.bf16.msra.mxu1 %v562_v3  ;;  %77 = vxpose.xlu0.b32.end [2/2] (short) (narrow) %v71_v2, 16  ;;  %60 = vst.msk [vmem:[#allocation2] sm:$0xff] %vm59_vm3, %v635_v8  ;;  %63 = vst.msk [vmem:[#allocation3] sm:$0xff] %vm59_vm3, %v635_v8 }
  0x2b   :  { %280 = vxpose.xlu1.b32.end [2/2] (short) (narrow) %v73_v4, 16  ;;  %561 = vmatpush3.bf16.msra.mxu0 %v558_v5  ;;  %65 = vst.msk [vmem:[#allocation4] sm:$0xff] %vm59_vm3, %v635_v8  ;;  %67 = vst.msk [vmem:[#allocation5] sm:$0xff] %vm59_vm3, %v635_v8 }
  0x2c   :  { %570 = vmatprep.subr.bf16.mxu1 %v634_v7  ;;  %567 = vmatprep.subr.bf16.mxu0 %v558_v5 }
  0x2d   :  { %v397_v13 = vld [vmem:[#allocation6] sm:$0xff] }
  0x2f   :  { %v75_v14 = vld [vmem:[#allocation2 + $0x8] sm:$0x3]  ;;  %v197_v15 = vld [vmem:[#allocation3 + $0x8] sm:$0x3] }
  0x30   :  { %v278_v26 = vld [vmem:[#allocation4 + $0x8] sm:$0x3] }
  0x31   :  { %v74_v16 = vld [vmem:[#allocation2] sm:$0xff]  ;;  %v196_v17 = vld [vmem:[#allocation3] sm:$0xff] }
  0x32   :  { %v396_v27 = vld [vmem:[#allocation5] sm:$0xff]  ;;  %v277_v28 = vld [vmem:[#allocation4] sm:$0xff] }
  0xa6   :  { %v92_v9 = vpop.trf.xlu0 }
  0xa7   :  { %v295_v10 = vpop.trf.xlu1  ;;  %534 = vmatprep.mubr.msk.f32.mxu0 %vm68_vm0, %v92_v9  ;;  %541 = vmatprep.mubr.msk.f32.mxu1 %vm68_vm0, %v92_v9 }
  0xaa   :  { %v93_v11 = vpop.trf.xlu0 }
  0xab   :  { %535 = vmatmul.mubr.msk.f32.vlgmr.msra.gmra.mrb[0].mxu0 %vm68_vm0, %v93_v11  ;;  %542 = vmatmul.mubr.msk.f32.vlgmr.msra.gmra.mrb[0].mxu1 %vm68_vm0, %v93_v11  ;;  %v296_v12 = vpop.trf.xlu1 }
  0xac   :  { %569 = vmatpush3.bf16.msra.mxu0 %v558_v5  ;;  %548 = vmatprep.mubr.msk.f32.mxu0 %vm68_vm0, %v295_v10 }
  0xad   :  { %572 = vmatpush3.bf16.msra.mxu1 %v562_v3  ;;  %555 = vmatprep.mubr.msk.f32.mxu1 %vm636_vm2, %v635_v8 }
  0xaf   :  { %549 = vmatmul.mubr.msk.f32.vlgmr.msra.gmra.mrb[2].mxu0 %vm68_vm0, %v296_v12 }
  0xb0   :  { %556 = vmatmul.mubr.msk.f32.vlgmr.msra.gmra.mrb[2].mxu1 %vm68_vm0, %v397_v13 }
 0x17e   :  { %v536_v18 = vpop.f32.mrb[0].mxu0  ;;  %v543_v19 = vpop.f32.mrb[0].mxu1 }
 0x17f   :  { %v191_v20 = vadd.f32 %v536_v18, %v75_v14  ;;  %v274_v21 = vadd.f32 %v543_v19, %v197_v15  ;;  %v181_v22 = vpop.f32.mrb[1].mxu0  ;;  %v264_v23 = vpop.f32.mrb[1].mxu1 }
 0x180   :  { %v190_v24 = vadd.f32 %v181_v22, %v74_v16  ;;  %v273_v25 = vadd.f32 %v264_v23, %v196_v17 }
 0x181   :  { %195 = vst.msk [vmem:[#allocation2 + $0x8] sm:$0x3] %vm61_vm1, %v191_v20  ;;  %276 = vst.msk [vmem:[#allocation3 + $0x8] sm:$0x3] %vm61_vm1, %v274_v21 }
 0x182   :  { %193 = vst.msk [vmem:[#allocation2] sm:$0xff] %vm59_vm3, %v190_v24  ;;  %275 = vst.msk [vmem:[#allocation3] sm:$0xff] %vm59_vm3, %v273_v25  ;;  %v550_v29 = vpop.f32.mrb[2].mxu0 }
 0x183   :  { %v393_v30 = vadd.f32 %v550_v29, %v278_v26  ;;  %v467_v31 = vpop.f32.mrb[2].mxu1  ;;  %v383_v32 = vpop.f32.mrb[3].mxu0 }
 0x184   :  { %v471_v33 = vadd.f32 %v467_v31, %v396_v27  ;;  %v392_v34 = vadd.f32 %v383_v32, %v277_v28  ;;  %v557_v35 = vpop.f32.mrb[3].mxu1 }
 0x185   :  { %395 = vst.msk [vmem:[#allocation4 + $0x8] sm:$0x3] %vm61_vm1, %v393_v30 }
 0x186   :  { %472 = vst.msk [vmem:[#allocation5] sm:$0xff] %vm59_vm3, %v471_v33  ;;  %394 = vst.msk [vmem:[#allocation4] sm:$0xff] %vm59_vm3, %v392_v34 }
 0x188   :  { %v477_v36 = vld [vmem:[#allocation2 + $0x8] sm:$0x3]  ;;  %v481_v37 = vld [vmem:[#allocation3 + $0x8] sm:$0x3] }
 0x189   :  { %479 = vst.msk [vmem:[%s743_s2 + $0x8] sm:$0x3] %vm61_vm1, %v477_v36  ;;  %483 = vst.msk [vmem:[%s744_s3 + $0x8] sm:$0x3] %vm61_vm1, %v481_v37  ;;  %v476_v38 = vld [vmem:[#allocation2] sm:$0xff]  ;;  %v480_v39 = vld [vmem:[#allocation3] sm:$0xff] }
 0x18a   :  { %478 = vst.msk [vmem:[%s743_s2] sm:$0xff] %vm59_vm3, %v476_v38  ;;  %482 = vst.msk [vmem:[%s744_s3] sm:$0xff] %vm59_vm3, %v480_v39 }
 0x18c   :  { %v485_v40 = vld [vmem:[#allocation4 + $0x8] sm:$0x3] }
 0x18d   :  { %487 = vst.msk [vmem:[%s745_s4 + $0x8] sm:$0x3] %vm61_vm1, %v485_v40  ;;  %v488_v41 = vld [vmem:[#allocation5] sm:$0xff]  ;;  %v484_v42 = vld [vmem:[#allocation4] sm:$0xff] }
 0x18e   :  { %489 = vst.msk [vmem:[%s746_s5] sm:$0xff] %vm59_vm3, %v488_v41  ;;  %486 = vst.msk [vmem:[%s745_s4] sm:$0xff] %vm59_vm3, %v484_v42 }
 0x18f   :  { %506 = vsyncpa [#allocation8], 1 }
 0x190   :  { %507 = vsyncpa [#allocation10], 1 }

</bundles_post_ra>
